<compile_context>
chip_gen: v5e
topology: v5e:2x2
jax: 0.10.0
libtpu: 0.0.40
codegen_flags: <defaults>
</compile_context>

<pallas_src>
import math
from functools import partial

import jax
import jax.numpy as jnp
from jax.experimental import pallas as pl
from jax.experimental.pallas import tpu as pltpu

LN_EPS = 1e-5                     # nn.LayerNorm default
GN_EPS = 1e-6                     # Normalize() GroupNorm eps
VMEM_LIMIT_BYTES = 32 * 1024 * 1024   # explicit scoped-VMEM cap (v5e default is only 16MiB)
NEG_FILL = -jnp.finfo(jnp.float32).max


# ------------------------------ helpers -------------------------------------


def _layernorm(x, gamma, beta):
    mu = jnp.mean(x, axis=-1, keepdims=True)
    var = jnp.mean((x - mu) ** 2, axis=-1, keepdims=True)
    return (x - mu) * jax.lax.rsqrt(var + LN_EPS) * gamma + beta


def _tile(n, targets=(512, 256, 128)):
    """Largest clean tile from `targets` that divides n; else the whole extent."""
    for t in targets:
        if n >= t and n % t == 0:
            return t
    return n


def _resident_spec(shape):
    """Spec for a weight/bias resident for the whole grid: constant index_map,
    single-buffered (double-buffering constants doubles VMEM for zero benefit)."""
    index_map = lambda *_: (0,) * len(shape)
    try:
        return pl.BlockSpec(shape, index_map, pipeline_mode=pl.Buffered(1))
    except Exception:  # pragma: no cover - fallback if pipeline_mode is unavailable
        return pl.BlockSpec(shape, index_map)


def _compiler_params(dimension_semantics):
    return pltpu.CompilerParams(dimension_semantics=dimension_semantics,
                                vmem_limit_bytes=VMEM_LIMIT_BYTES)


# ------------------------------ kernels -------------------------------------


def _kv_proj_kernel(src_ref, *args, heads, dim_head, use_ln):
    """(optional LN) + full-width K/V projection of one kv tile, head-major outputs."""
    if use_ln:
        g_ref, b_ref, w_ref, k_ref, v_ref = args
    else:
        w_ref, k_ref, v_ref = args
    x = src_ref[0].astype(jnp.float32)
    if use_ln:
        x = _layernorm(x, g_ref[...], b_ref[...])
    kv = jnp.dot(x.astype(jnp.bfloat16), w_ref[...],
                 preferred_element_type=jnp.float32).astype(jnp.bfloat16)  # (tk, 2*inner)
    inner = heads * dim_head
    for h in range(heads):
        lo = h * dim_head
        k_ref[0, h] = kv[:, lo:lo + dim_head]
        v_ref[0, h] = kv[:, inner + lo:inner + lo + dim_head]


def _attn_kernel(x_ref, k_ref, v_ref, g_ref, b_ref, wq_ref, wo_ref, bo_ref, *rest,
                 heads, dim_head, use_mask):
    """Fused LN + full-width Q proj + flash attention (precomputed K/V) + out-proj
    + residual for one q-tile."""
    if use_mask:
        mask_ref, o_ref, q_scr, acc_scr, m_scr, l_scr = rest
    else:
        o_ref, q_scr, acc_scr, m_scr, l_scr = rest

    ki = pl.program_id(2)
    nk = pl.num_programs(2)

    # ---- first kv step of this (batch, q-tile): LN(x), Q projection, zero state.
    @pl.when(ki == 0)
    def _():
        x = x_ref[0].astype(jnp.float32)
        xn = _layernorm(x, g_ref[...], b_ref[...]).astype(jnp.bfloat16)
        # single (tq, dim) x (dim, inner) MXU matmul; softmax scale folded into wq.
        q = jnp.dot(xn, wq_ref[...],
                    preferred_element_type=jnp.float32).astype(jnp.bfloat16)
        for h in range(heads):
            q_scr[h] = q[:, h * dim_head:(h + 1) * dim_head]
        m_scr[...] = jnp.full(m_scr.shape, -jnp.inf, jnp.float32)
        l_scr[...] = jnp.zeros(l_scr.shape, jnp.float32)
        acc_scr[...] = jnp.zeros(acc_scr.shape, jnp.float32)

    # ---- mask bias hoisted out of the per-head loop (one select per kv step).
    if use_mask:
        bias = jnp.where(mask_ref[0] == 1, 0.0, NEG_FILL)          # (1, tk)

    # ---- online softmax over this kv tile, per head (K/V precomputed, head-major).
    for h in range(heads):
        kh = k_ref[0, h]                                           # (tk, d_head) bf16
        vh = v_ref[0, h]
        sim = jax.lax.dot_general(q_scr[h], kh, (((1,), (1,)), ((), ())),
                                  preferred_element_type=jnp.float32)   # (tq, tk)
        if use_mask:
            sim = sim + bias
        m_prev = m_scr[h]                                          # (tq, 1)
        m_new = jnp.maximum(m_prev, jnp.max(sim, axis=-1, keepdims=True))
        alpha = jnp.exp(m_prev - m_new)
        p = jnp.exp(sim - m_new)
        l_scr[h] = alpha * l_scr[h] + jnp.sum(p, axis=-1, keepdims=True)
        acc_scr[h] = alpha * acc_scr[h] + jnp.dot(p.astype(jnp.bfloat16), vh,
                                                  preferred_element_type=jnp.float32)
        m_scr[h] = m_new

    # ---- last kv step: normalize, single full-width out-projection, bias + residual.
    @pl.when(ki == nk - 1)
    def _():
        outs = []
        for h in range(heads):
            inv_l = pl.reciprocal(l_scr[h], approx=True)
            outs.append((acc_scr[h] * inv_l).astype(jnp.bfloat16))
        o_full = jnp.concatenate(outs, axis=-1)                    # (tq, inner)
        y = jnp.dot(o_full, wo_ref[...], preferred_element_type=jnp.float32)
        o_ref[0] = (y + bo_ref[...] + x_ref[0].astype(jnp.float32)).astype(o_ref.dtype)


def _ff_kernel(x_ref, g_ref, b_ref, w1a_ref, w1g_ref, b1a_ref, b1g_ref,
               w2_ref, b2_ref, o_ref, xn_scr, acc_scr):
    """Fused LN + GEGLU MLP + residual, chunked over the ff hidden dimension."""
    c = pl.program_id(2)
    nc = pl.num_programs(2)

    @pl.when(c == 0)
    def _():
        x = x_ref[0].astype(jnp.float32)
        xn_scr[...] = _layernorm(x, g_ref[...], b_ref[...]).astype(jnp.bfloat16)
        acc_scr[...] = jnp.zeros(acc_scr.shape, jnp.float32)

    xn = xn_scr[...]
    a = jnp.dot(xn, w1a_ref[...], preferred_element_type=jnp.float32) + b1a_ref[...]
    gate = jnp.dot(xn, w1g_ref[...], preferred_element_type=jnp.float32) + b1g_ref[...]
    # exact (erf) GELU, matching torch.nn.functional.gelu default
    h = a * (0.5 * gate * (1.0 + jax.lax.erf(gate * (1.0 / math.sqrt(2.0)))))
    acc_scr[...] += jnp.dot(h.astype(jnp.bfloat16), w2_ref[...],
                            preferred_element_type=jnp.float32)

    @pl.when(c == nc - 1)
    def _():
        o_ref[0] = (acc_scr[...] + b2_ref[...] + x_ref[0].astype(jnp.float32)
                    ).astype(o_ref.dtype)


def _gn_projin_kernel(x_ref, *args, csize):
    """Fused GroupNorm (two-pass stats) + affine + 1x1-conv proj_in.

    Reads x in its native (C, N) channel-major layout and emits (N, inner) tokens."""
    if csize > 1:
        gr_ref, ge_ref, gg_ref, gb_ref, w_ref, b_ref, o_ref = args
    else:
        gg_ref, gb_ref, w_ref, b_ref, o_ref = args

    x = x_ref[0].astype(jnp.float32)                         # (C, N)
    inv_n = 1.0 / x.shape[1]
    mu_c = jnp.sum(x, axis=1, keepdims=True) * inv_n         # per-channel mean (C, 1)
    if csize > 1:
        # tiny factorized group reduce/expand (replaces the (C, C) block-diagonal gmat)
        mu_ch = jnp.dot(ge_ref[...],
                        jnp.dot(gr_ref[...], mu_c, preferred_element_type=jnp.float32),
                        preferred_element_type=jnp.float32)
    else:
        mu_ch = mu_c                                         # one channel per group
    d = x - mu_ch
    var_c = jnp.sum(d * d, axis=1, keepdims=True) * inv_n    # two-pass variance (exact)
    if csize > 1:
        var_ch = jnp.dot(ge_ref[...],
                         jnp.dot(gr_ref[...], var_c, preferred_element_type=jnp.float32),
                         preferred_element_type=jnp.float32)
    else:
        var_ch = var_c
    s = gg_ref[...] * jax.lax.rsqrt(var_ch + GN_EPS)         # (C, 1)
    xn = (d * s + gb_ref[...]).astype(jnp.bfloat16)          # (C, N)
    # tokens (N, inner) = xn^T @ w_in  (transposed-LHS MXU matmul, no wrapper transpose)
    y = jax.lax.dot_general(xn, w_ref[...], (((0,), (0,)), ((), ())),
                            preferred_element_type=jnp.float32)
    o_ref[0] = (y + b_ref[...]).astype(o_ref.dtype)


def _projout_kernel(h_ref, xin_ref, w_ref, b_ref, o_ref):
    """1x1-conv proj_out + residual; writes the (C, N) channel-major output directly."""
    hb = h_ref[0].astype(jnp.bfloat16)                       # (tq, inner)
    # (C, tq) = w_out^T @ h^T  via contraction over `inner` of both operands (A @ B.T)
    y = jax.lax.dot_general(w_ref[...], hb, (((1,), (1,)), ((), ())),
                            preferred_element_type=jnp.float32)
    o_ref[0] = (y + b_ref[...] + xin_ref[0].astype(jnp.float32)).astype(o_ref.dtype)


# ------------------------------ pallas_call wrappers -------------------------


def _kv_proj_call(src, gamma, beta, wkv, *, heads, dim_head):
    B, M, d_in = src.shape
    tk = _tile(M)
    use_ln = gamma is not None
    kernel = partial(_kv_proj_kernel, heads=heads, dim_head=dim_head, use_ln=use_ln)

    in_specs = [pl.BlockSpec((1, tk, d_in), lambda b, ki: (b, ki, 0))]
    args = [src]
    if use_ln:
        in_specs += [_resident_spec(gamma.shape), _resident_spec(beta.shape)]
        args += [gamma, beta]
    in_specs.append(_resident_spec(wkv.shape))
    args.append(wkv)

    out_shape = jax.ShapeDtypeStruct((B, heads, M, dim_head), jnp.bfloat16)
    out_spec = pl.BlockSpec((1, heads, tk, dim_head), lambda b, ki: (b, 0, ki, 0))
    return pl.pallas_call(
        kernel,
        out_shape=(out_shape, out_shape),
        grid=(B, M // tk),
        in_specs=in_specs,
        out_specs=(out_spec, out_spec),
        compiler_params=_compiler_params(("parallel", "parallel")),
    )(*args)


def _attn_call(x, k, v, mask, gamma, beta, wq, wo, bo, *, heads, dim_head):
    B, N, dim = x.shape
    M = k.shape[2]
    tq = _tile(N)
    tk = _tile(M)
    use_mask = mask is not None
    kernel = partial(_attn_kernel, heads=heads, dim_head=dim_head, use_mask=use_mask)

    in_specs = [
        pl.BlockSpec((1, tq, dim), lambda b, qi, ki: (b, qi, 0)),
        pl.BlockSpec((1, heads, tk, dim_head), lambda b, qi, ki: (b, 0, ki, 0)),
        pl.BlockSpec((1, heads, tk, dim_head), lambda b, qi, ki: (b, 0, ki, 0)),
        _resident_spec(gamma.shape), _resident_spec(beta.shape),
        _resident_spec(wq.shape), _resident_spec(wo.shape), _resident_spec(bo.shape),
    ]
    args = [x, k, v, gamma, beta, wq, wo, bo]
    if use_mask:
        in_specs.append(pl.BlockSpec((1, 1, tk), lambda b, qi, ki: (b, 0, ki)))
        args.append(mask)

    # NOTE: B * (N // tq) independent (parallel) work items feed the v7x megacore.
    return pl.pallas_call(
        kernel,
        out_shape=jax.ShapeDtypeStruct((B, N, dim), x.dtype),
        grid=(B, N // tq, M // tk),
        in_specs=in_specs,
        out_specs=pl.BlockSpec((1, tq, dim), lambda b, qi, ki: (b, qi, 0)),
        scratch_shapes=[
            pltpu.VMEM((heads, tq, dim_head), jnp.bfloat16),   # Q (per q-tile)
            pltpu.VMEM((heads, tq, dim_head), jnp.float32),    # online-softmax acc
            pltpu.VMEM((heads, tq, 1), jnp.float32),           # running max m
            pltpu.VMEM((heads, tq, 1), jnp.float32),           # running sum l
        ],
        compiler_params=_compiler_params(("parallel", "parallel", "arbitrary")),
    )(*args)


def _ff_call(x, gamma, beta, w1a, w1g, b1a, b1g, w2, b2):
    B, N, dim = x.shape
    ff_inner = w2.shape[0]
    tq = _tile(N)
    fc = _tile(ff_inner, (2048, 1024, 512, 256, 128))      # GEGLU hidden-dim chunk
    return pl.pallas_call(
        _ff_kernel,
        out_shape=jax.ShapeDtypeStruct((B, N, dim), x.dtype),
        grid=(B, N // tq, ff_inner // fc),
        in_specs=[
            pl.BlockSpec((1, tq, dim), lambda b, qi, c: (b, qi, 0)),
            _resident_spec(gamma.shape), _resident_spec(beta.shape),
            pl.BlockSpec((dim, fc), lambda b, qi, c: (0, c)),
            pl.BlockSpec((dim, fc), lambda b, qi, c: (0, c)),
            pl.BlockSpec((1, fc), lambda b, qi, c: (0, c)),
            pl.BlockSpec((1, fc), lambda b, qi, c: (0, c)),
            pl.BlockSpec((fc, dim), lambda b, qi, c: (c, 0)),
            _resident_spec(b2.shape),
        ],
        out_specs=pl.BlockSpec((1, tq, dim), lambda b, qi, c: (b, qi, 0)),
        scratch_shapes=[
            pltpu.VMEM((tq, dim), jnp.bfloat16),    # LN(x) for this q-tile
            pltpu.VMEM((tq, dim), jnp.float32),     # output accumulator
        ],
        compiler_params=_compiler_params(("parallel", "parallel", "arbitrary")),
    )(x, gamma, beta, w1a, w1g, b1a, b1g, w2, b2)


def _gn_projin_call(x_cn, gn_g, gn_b, g_reduce, g_expand, w_in, b_in, *, groups):
    B, C, N = x_cn.shape
    inner = w_in.shape[1]
    cs = C // groups
    kernel = partial(_gn_projin_kernel, csize=cs)

    in_specs = [pl.BlockSpec((1, C, N), lambda b: (b, 0, 0))]
    args = [x_cn]
    if cs > 1:
        in_specs += [_resident_spec(g_reduce.shape), _resident_spec(g_expand.shape)]
        args += [g_reduce, g_expand]
    in_specs += [_resident_spec(gn_g.shape), _resident_spec(gn_b.shape),
                 _resident_spec(w_in.shape), _resident_spec(b_in.shape)]
    args += [gn_g, gn_b, w_in, b_in]

    return pl.pallas_call(
        kernel,
        out_shape=jax.ShapeDtypeStruct((B, N, inner), jnp.float32),
        grid=(B,),
        in_specs=in_specs,
        out_specs=pl.BlockSpec((1, N, inner), lambda b: (b, 0, 0)),
        compiler_params=_compiler_params(("parallel",)),
    )(*args)


def _projout_call(h_tok, x_cn, w_out_ct, b_out_col):
    B, N, inner = h_tok.shape
    C = w_out_ct.shape[0]
    tq = _tile(N)
    return pl.pallas_call(
        _projout_kernel,
        out_shape=jax.ShapeDtypeStruct((B, C, N), x_cn.dtype),
        grid=(B, N // tq),
        in_specs=[
            pl.BlockSpec((1, tq, inner), lambda b, qi: (b, qi, 0)),
            pl.BlockSpec((1, C, tq), lambda b, qi: (b, 0, qi)),
            _resident_spec(w_out_ct.shape), _resident_spec(b_out_col.shape),
        ],
        out_specs=pl.BlockSpec((1, C, tq), lambda b, qi: (b, 0, qi)),
        compiler_params=_compiler_params(("parallel", "parallel")),
    )(h_tok, x_cn, w_out_ct, b_out_col)


# ------------------------------ model forward --------------------------------


def basic_transformer_block(p, x, context=None, mask=None, *, heads, d_head):
    """x = attn1(norm1(x)) + x ; x = attn2(norm2(x), ctx, mask) + x ; x = ff(norm3(x)) + x"""
    # attn1: self-attention, never masked (reference _forward passes no mask)
    k1, v1 = _kv_proj_call(x, p['ln1_g'], p['ln1_b'], p['wkv1'],
                           heads=heads, dim_head=d_head)
    x = _attn_call(x, k1, v1, None, p['ln1_g'], p['ln1_b'],
                   p['wq1'], p['wo1'], p['bo1'], heads=heads, dim_head=d_head)
    # attn2: cross-attention; with context=None it degenerates to mask-less self-attn
    if context is None:
        k2, v2 = _kv_proj_call(x, p['ln2_g'], p['ln2_b'], p['wkv2'],
                               heads=heads, dim_head=d_head)
        x = _attn_call(x, k2, v2, None, p['ln2_g'], p['ln2_b'],
                       p['wq2'], p['wo2'], p['bo2'], heads=heads, dim_head=d_head)
    else:
        k2, v2 = _kv_proj_call(context, None, None, p['wkv2'],
                               heads=heads, dim_head=d_head)
        m = None
        if mask is not None:
            m = mask.reshape(mask.shape[0], 1, -1).astype(jnp.int32)
        x = _attn_call(x, k2, v2, m, p['ln2_g'], p['ln2_b'],
                       p['wq2'], p['wo2'], p['bo2'], heads=heads, dim_head=d_head)
    # GEGLU feed-forward
    x = _ff_call(x, p['ln3_g'], p['ln3_b'],
                 p['w1a'], p['w1g'], p['b1a'], p['b1g'], p['w2'], p['b2'])
    return x


def spatial_transformer(kp, x, context=None, mask=None, *, heads, d_head):
    """Full SpatialTransformer forward on (B, C, H, W)."""
    B, C, H, W = x.shape
    x_cn = x.reshape(B, C, H * W)            # free reshape; kernels consume native layout
    h = _gn_projin_call(x_cn, kp['gn_g'], kp['gn_b'], kp['g_reduce'], kp['g_expand'],
                        kp['w_in'], kp['b_in'], groups=kp['groups'])
    for blk in kp['blocks']:
        h = basic_transformer_block(blk, h, context=context, mask=mask,
                                    heads=heads, d_head=d_head)
    out_cn = _projout_call(h, x_cn, kp['w_out'], kp['b_out'])   # (B, C, N) incl. residual
    return out_cn.reshape(B, C, H, W)


# --------------------------- params (torch layout) ----------------------------


def init_params(key, in_channels, n_heads, d_head, *, context_dim=None,
                depth=1, ff_mult=4):
    inner = n_heads * d_head
    cdim = inner if context_dim is None else context_dim
    ff_inner = inner * ff_mult

    keys = iter(jax.random.split(key, 8 + depth * 24))
    nk = lambda: next(keys)

    def w(k, shape, s=0.05):
        return (jax.random.normal(k, shape) * s).astype(jnp.float32)

    blocks = []
    for _ in range(depth):
        blocks.append(dict(
            ln1_g=(1.0 + 0.1 * jax.random.normal(nk(), (1, inner))).astype(jnp.float32),
            ln1_b=(0.1 * jax.random.normal(nk(), (1, inner))).astype(jnp.float32),
            wq1=w(nk(), (inner, inner)), wk1=w(nk(), (inner, inner)),
            wv1=w(nk(), (inner, inner)), wo1=w(nk(), (inner, inner)),
            bo1=(0.02 * jax.random.normal(nk(), (1, inner))).astype(jnp.float32),
            ln2_g=(1.0 + 0.1 * jax.random.normal(nk(), (1, inner))).astype(jnp.float32),
            ln2_b=(0.1 * jax.random.normal(nk(), (1, inner))).astype(jnp.float32),
            wq2=w(nk(), (inner, inner)), wk2=w(nk(), (cdim, inner)),
            wv2=w(nk(), (cdim, inner)), wo2=w(nk(), (inner, inner)),
            bo2=(0.02 * jax.random.normal(nk(), (1, inner))).astype(jnp.float32),
            ln3_g=(1.0 + 0.1 * jax.random.normal(nk(), (1, inner))).astype(jnp.float32),
            ln3_b=(0.1 * jax.random.normal(nk(), (1, inner))).astype(jnp.float32),
            w1=w(nk(), (inner, 2 * ff_inner)),
            b1=(0.02 * jax.random.normal(nk(), (1, 2 * ff_inner))).astype(jnp.float32),
            w2=w(nk(), (ff_inner, inner)),
            b2=(0.02 * jax.random.normal(nk(), (1, inner))).astype(jnp.float32),
        ))

    return dict(
        gn_g=(1.0 + 0.1 * jax.random.normal(nk(), (1, in_channels))).astype(jnp.float32),
        gn_b=(0.1 * jax.random.normal(nk(), (1, in_channels))).astype(jnp.float32),
        w_in=w(nk(), (in_channels, inner), s=0.1),
        b_in=(0.02 * jax.random.normal(nk(), (1, inner))).astype(jnp.float32),
        # NOTE: the PyTorch module zero-inits proj_out (zero_module); random values here
        # so the end-to-end check exercises the kernels — the forward math is identical.
        w_out=w(nk(), (inner, in_channels)),
        b_out=(0.02 * jax.random.normal(nk(), (1, in_channels))).astype(jnp.float32),
        blocks=blocks,
    )


def preprocess_params(p, *, heads, d_head, groups):
    """torch-layout f32 params -> kernel layout (bf16, scale folded into wq, fused wkv,
    split GEGLU, factorized GroupNorm group matrices, transposed proj_out)."""
    C = p['gn_g'].shape[-1]
    cs = C // groups
    scale = d_head ** -0.5
    gidx = jnp.arange(C) // cs
    g_reduce = (jnp.arange(groups)[:, None] == gidx[None, :]).astype(jnp.float32) / cs
    g_expand = (gidx[:, None] == jnp.arange(groups)[None, :]).astype(jnp.float32)

    blocks = []
    for blk in p['blocks']:
        ff_inner = blk['w2'].shape[0]
        blocks.append(dict(
            ln1_g=blk['ln1_g'], ln1_b=blk['ln1_b'],
            wq1=(blk['wq1'] * scale).astype(jnp.bfloat16),
            wkv1=jnp.concatenate([blk['wk1'], blk['wv1']], axis=1).astype(jnp.bfloat16),
            wo1=blk['wo1'].astype(jnp.bfloat16), bo1=blk['bo1'],
            ln2_g=blk['ln2_g'], ln2_b=blk['ln2_b'],
            wq2=(blk['wq2'] * scale).astype(jnp.bfloat16),
            wkv2=jnp.concatenate([blk['wk2'], blk['wv2']], axis=1).astype(jnp.bfloat16),
            wo2=blk['wo2'].astype(jnp.bfloat16), bo2=blk['bo2'],
            ln3_g=blk['ln3_g'], ln3_b=blk['ln3_b'],
            w1a=blk['w1'][:, :ff_inner].astype(jnp.bfloat16),
            w1g=blk['w1'][:, ff_inner:].astype(jnp.bfloat16),
            b1a=blk['b1'][:, :ff_inner], b1g=blk['b1'][:, ff_inner:],
            w2=blk['w2'].astype(jnp.bfloat16), b2=blk['b2'],
        ))
    return dict(
        groups=groups,
        g_reduce=g_reduce, g_expand=g_expand,
        gn_g=p['gn_g'].reshape(C, 1), gn_b=p['gn_b'].reshape(C, 1),
        w_in=p['w_in'].astype(jnp.bfloat16), b_in=p['b_in'],
        w_out=jnp.transpose(p['w_out']).astype(jnp.bfloat16),      # (C, inner)
        b_out=p['b_out'].reshape(C, 1),
        blocks=blocks,
    )


# ------------------------------ pure-JAX reference ----------------------------


def reference_block(p, x, context, mask, *, heads, d_head):
    def ln(t, g, b):
        mu = jnp.mean(t, -1, keepdims=True)
        var = jnp.mean((t - mu) ** 2, -1, keepdims=True)
        return (t - mu) / jnp.sqrt(var + LN_EPS) * g + b

    def attn(xq, ctx, m, wq, wk, wv, wo, bo):
        q, k, v = xq @ wq, ctx @ wk, ctx @ wv
        B, N, inner = q.shape
        M = k.shape[1]
        qh = q.reshape(B, N, heads, d_head).transpose(0, 2, 1, 3)
        kh = k.reshape(B, M, heads, d_head).transpose(0, 2, 1, 3)
        vh = v.reshape(B, M, heads, d_head).transpose(0, 2, 1, 3)
        sim = jnp.einsum('bhid,bhjd->bhij', qh, kh) * (d_head ** -0.5)
        if m is not None:
            sim = jnp.where(m.reshape(B, 1, 1, M) == 1, sim, -jnp.finfo(sim.dtype).max)
        pr = jax.nn.softmax(sim, axis=-1)
        o = jnp.einsum('bhij,bhjd->bhid', pr, vh).transpose(0, 2, 1, 3).reshape(B, N, inner)
        return o @ wo + bo

    h1 = ln(x, p['ln1_g'], p['ln1_b'])
    x = attn(h1, h1, None, p['wq1'], p['wk1'], p['wv1'], p['wo1'], p['bo1']) + x
    h2 = ln(x, p['ln2_g'], p['ln2_b'])
    ctx = context if context is not None else h2
    m = mask if context is not None else None
    x = attn(h2, ctx, m, p['wq2'], p['wk2'], p['wv2'], p['wo2'], p['bo2']) + x
    h3 = ln(x, p['ln3_g'], p['ln3_b'])
    proj = h3 @ p['w1'] + p['b1']
    a, gate = jnp.split(proj, 2, axis=-1)
    return (a * jax.nn.gelu(gate, approximate=False)) @ p['w2'] + p['b2'] + x


def reference_spatial_transformer(p, x, context, mask, *, heads, d_head, groups):
    B, C, H, W = x.shape
    xg = x.reshape(B, groups, C // groups, H, W)
    mu = xg.mean(axis=(2, 3, 4), keepdims=True)
    var = xg.var(axis=(2, 3, 4), keepdims=True)
    xn = ((xg - mu) / jnp.sqrt(var + GN_EPS)).reshape(B, C, H, W)
    xn = xn * p['gn_g'].reshape(1, C, 1, 1) + p['gn_b'].reshape(1, C, 1, 1)
    h = jnp.einsum('bchw,ci->bihw', xn, p['w_in']) + p['b_in'].reshape(1, -1, 1, 1)
    h = h.reshape(B, -1, H * W).transpose(0, 2, 1)
    for blk in p['blocks']:
        h = reference_block(blk, h, context, mask, heads=heads, d_head=d_head)
    h = h @ p['w_out'] + p['b_out']
    h = h.transpose(0, 2, 1).reshape(B, C, H, W)
    return h + x


# ---------------------------------- main --------------------------------------


if __name__ == "__main__":
    key = jax.random.PRNGKey(0)
    B, C, H, W = 2, 32, 16, 16           # N = 256 tokens
    n_heads, d_head = 4, 64              # inner dim = 256
    M, context_dim = 256, 64
    groups = 32                          # Normalize() uses GroupNorm(32)

    k_x, k_c, k_m, k_p1, k_p2 = jax.random.split(key, 5)
    x = jax.random.normal(k_x, (B, C, H, W), jnp.float32)
    context = jax.random.normal(k_c, (B, M, context_dim), jnp.float32)
    mask = (jax.random.uniform(k_m, (B, M)) > 0.3).astype(jnp.int32)
    mask = mask.at[:, 0].set(1)          # keep at least one valid context token

    # --- cross-attention configuration (context + mask provided) ---
    params = init_params(k_p1, C, n_heads, d_head, context_dim=context_dim)
    kp = preprocess_params(params, heads=n_heads, d_head=d_head, groups=groups)
    out = spatial_transformer(kp, x, context=context, mask=mask,
                              heads=n_heads, d_head=d_head)
    out = jax.block_until_ready(out)
    ref = reference_spatial_transformer(params, x, context, mask,
                                        heads=n_heads, d_head=d_head, groups=groups)
    assert out.shape == x.shape and out.dtype == jnp.float32
    assert jnp.allclose(out, ref, atol=5e-2, rtol=5e-2), (
        "cross-attn mismatch, max abs err %e" % float(jnp.max(jnp.abs(out - ref))))

    # --- zero_module(proj_out) behavior: forward must return x exactly ---
    params_zero = dict(params, w_out=jnp.zeros_like(params['w_out']),
                       b_out=jnp.zeros_like(params['b_out']))
    kp_zero = preprocess_params(params_zero, heads=n_heads, d_head=d_head, groups=groups)
    out_zero = spatial_transformer(kp_zero, x, context=context, mask=mask,
                                   heads=n_heads, d_head=d_head)
    out_zero = jax.block_until_ready(out_zero)
    assert jnp.allclose(out_zero, x, atol=1e-6), "zero-init proj_out residual mismatch"

    # --- self-only configuration (context=None path) ---
    params_s = init_params(k_p2, C, n_heads, d_head, context_dim=None)
    kp_s = preprocess_params(params_s, heads=n_heads, d_head=d_head, groups=groups)
    out2 = spatial_transformer(kp_s, x, heads=n_heads, d_head=d_head)
    out2 = jax.block_until_ready(out2)
    ref2 = reference_spatial_transformer(params_s, x, None, None,
                                         heads=n_heads, d_head=d_head, groups=groups)
    assert jnp.allclose(out2, ref2, atol=5e-2, rtol=5e-2), "self-attn mismatch"

    print("KERNEL_OK")
</pallas_src>

<mosaic_0001>
module attributes {stable_mosaic.version = 11 : i64} {
  func.func @_gn_projin_kernel(%arg0: i32, %arg1: memref<1x32x256xf32, #tpu.memory_space<vmem>>, %arg2: memref<32x1xf32, #tpu.memory_space<vmem>>, %arg3: memref<32x1xf32, #tpu.memory_space<vmem>>, %arg4: memref<32x256xbf16, #tpu.memory_space<vmem>>, %arg5: memref<1x256xf32, #tpu.memory_space<vmem>>, %arg6: memref<1x256x256xf32, #tpu.memory_space<vmem>>) attributes {dimension_semantics = [#tpu.dimension_semantics<parallel>], iteration_bounds = array<i64: 2>, scalar_prefetch = 0 : i64, scratch_operands = 0 : i64, tpu.core_type = #tpu.core_type<tc>, window_params = [{transform_indices = @transform_0, window_bounds = array<i64: 1, 32, 256>}, {pipeline_mode = #tpu.pipeline_mode<synchronous>, transform_indices = @transform_1, window_bounds = array<i64: 32, 1>}, {pipeline_mode = #tpu.pipeline_mode<synchronous>, transform_indices = @transform_2, window_bounds = array<i64: 32, 1>}, {pipeline_mode = #tpu.pipeline_mode<synchronous>, transform_indices = @transform_3, window_bounds = array<i64: 32, 256>}, {pipeline_mode = #tpu.pipeline_mode<synchronous>, transform_indices = @transform_4, window_bounds = array<i64: 1, 256>}, {transform_indices = @transform_5, window_bounds = array<i64: 1, 256, 256>}]} {
    %c0 = arith.constant 0 : index
    %c0_0 = arith.constant 0 : index
    %c0_1 = arith.constant 0 : index
    %0 = vector.load %arg1[%c0, %c0_0, %c0_1] : memref<1x32x256xf32, #tpu.memory_space<vmem>>, vector<1x32x256xf32>
    %1 = vector.shape_cast %0 : vector<1x32x256xf32> to vector<32x256xf32>
    %cst = arith.constant dense<0.000000e+00> : vector<32xf32>
    %2 = vector.multi_reduction <add>, %1, %cst [1] : vector<32x256xf32> to vector<32xf32>
    %3 = vector.shape_cast %2 : vector<32xf32> to vector<32x1xf32>
    %cst_2 = arith.constant 3.906250e-03 : f32
    %4 = vector.broadcast %cst_2 : f32 to vector<32x1xf32>
    %5 = arith.mulf %3, %4 : vector<32x1xf32>
    %6 = vector.broadcast %5 : vector<32x1xf32> to vector<32x256xf32>
    %7 = arith.subf %1, %6 : vector<32x256xf32>
    %8 = arith.mulf %7, %7 : vector<32x256xf32>
    %cst_3 = arith.constant dense<0.000000e+00> : vector<32xf32>
    %9 = vector.multi_reduction <add>, %8, %cst_3 [1] : vector<32x256xf32> to vector<32xf32>
    %10 = vector.shape_cast %9 : vector<32xf32> to vector<32x1xf32>
    %cst_4 = arith.constant 3.906250e-03 : f32
    %11 = vector.broadcast %cst_4 : f32 to vector<32x1xf32>
    %12 = arith.mulf %10, %11 : vector<32x1xf32>
    %c0_5 = arith.constant 0 : index
    %c0_6 = arith.constant 0 : index
    %13 = vector.load %arg2[%c0_5, %c0_6] : memref<32x1xf32, #tpu.memory_space<vmem>>, vector<32x1xf32>
    %cst_7 = arith.constant 9.99999997E-7 : f32
    %14 = vector.broadcast %cst_7 : f32 to vector<32x1xf32>
    %15 = arith.addf %12, %14 : vector<32x1xf32>
    %16 = math.rsqrt %15 : vector<32x1xf32>
    %17 = arith.mulf %13, %16 : vector<32x1xf32>
    %18 = vector.broadcast %17 : vector<32x1xf32> to vector<32x256xf32>
    %19 = arith.mulf %7, %18 : vector<32x256xf32>
    %c0_8 = arith.constant 0 : index
    %c0_9 = arith.constant 0 : index
    %20 = vector.load %arg3[%c0_8, %c0_9] : memref<32x1xf32, #tpu.memory_space<vmem>>, vector<32x1xf32>
    %21 = vector.broadcast %20 : vector<32x1xf32> to vector<32x256xf32>
    %22 = arith.addf %19, %21 : vector<32x256xf32>
    %23 = arith.truncf %22 : vector<32x256xf32> to vector<32x256xbf16>
    %c0_10 = arith.constant 0 : index
    %c0_11 = arith.constant 0 : index
    %24 = vector.load %arg4[%c0_10, %c0_11] : memref<32x256xbf16, #tpu.memory_space<vmem>>, vector<32x256xbf16>
    %cst_12 = arith.constant dense<0.000000e+00> : vector<256x256xf32>
    %25 = tpu.matmul %23, %24, %cst_12 {dimension_numbers = #tpu.dot_dimension_numbers<[0], [0], [1], [1], [0, 1, 1, 1], [], []>} : vector<32x256xbf16>, vector<32x256xbf16>, vector<256x256xf32> -> vector<256x256xf32>
    %c0_13 = arith.constant 0 : index
    %c0_14 = arith.constant 0 : index
    %26 = vector.load %arg5[%c0_13, %c0_14] : memref<1x256xf32, #tpu.memory_space<vmem>>, vector<1x256xf32>
    %27 = vector.broadcast %26 : vector<1x256xf32> to vector<256x256xf32>
    %28 = arith.addf %25, %27 : vector<256x256xf32>
    %c0_15 = arith.constant 0 : index
    %c0_16 = arith.constant 0 : index
    %c0_17 = arith.constant 0 : index
    %29 = vector.load %arg6[%c0_15, %c0_16, %c0_17] : memref<1x256x256xf32, #tpu.memory_space<vmem>>, vector<1x256x256xf32>
    %30 = vector.shape_cast %29 : vector<1x256x256xf32> to vector<256x256xf32>
    %31 = vector.shape_cast %28 : vector<256x256xf32> to vector<1x256x256xf32>
    tpu.vector_store %arg6[%c0_15, %c0_16, %c0_17], %31 {strides = array<i32>} : memref<1x256x256xf32, #tpu.memory_space<vmem>>, vector<1x256x256xf32>,
    return
  }
  func.func @transform_0(%arg0: i32) -> (i32, i32, i32) {
    %c0_i32 = arith.constant 0 : i32
    %c0_i32_0 = arith.constant 0 : i32
    %c0_i32_1 = arith.constant 0 : i32
    return %arg0, %c0_i32, %c0_i32_0 : i32, i32, i32
  }
  func.func @transform_1(%arg0: i32) -> (i32, i32) {
    %c0_i32 = arith.constant 0 : i32
    %c0_i32_0 = arith.constant 0 : i32
    %c0_i32_1 = arith.constant 0 : i32
    return %c0_i32, %c0_i32_0 : i32, i32
  }
  func.func @transform_2(%arg0: i32) -> (i32, i32) {
    %c0_i32 = arith.constant 0 : i32
    %c0_i32_0 = arith.constant 0 : i32
    %c0_i32_1 = arith.constant 0 : i32
    return %c0_i32, %c0_i32_0 : i32, i32
  }
  func.func @transform_3(%arg0: i32) -> (i32, i32) {
    %c0_i32 = arith.constant 0 : i32
    %c0_i32_0 = arith.constant 0 : i32
    %c0_i32_1 = arith.constant 0 : i32
    return %c0_i32, %c0_i32_0 : i32, i32
  }
  func.func @transform_4(%arg0: i32) -> (i32, i32) {
    %c0_i32 = arith.constant 0 : i32
    %c0_i32_0 = arith.constant 0 : i32
    %c0_i32_1 = arith.constant 0 : i32
    return %c0_i32, %c0_i32_0 : i32, i32
  }
  func.func @transform_5(%arg0: i32) -> (i32, i32, i32) {
    %c0_i32 = arith.constant 0 : i32
    %c0_i32_0 = arith.constant 0 : i32
    %c0_i32_1 = arith.constant 0 : i32
    return %arg0, %c0_i32, %c0_i32_0 : i32, i32, i32
  }
}

</mosaic_0001>

<bundles_post_ra>
// kernel: tpu_custom_call.1
= control target key start
LH: loop header
LB: loop body
LE: loop exit
PB: predicated region body
PF: predicated region fallthrough
CT: control target
= control target key end

     0   :  { %10 = vsyncpa [#allocation3], 0  ;;  %s1505_s0 = inlined_call_operand.hbm [shape: f32[2,32,256], index: 0, kind: input, shape index: {}]   ;;  %s1506_s1 = inlined_call_operand.vmem [shape: f32[32,1], index: 1, kind: input, shape index: {}]   ;;  %s1507_s2 = inlined_call_operand.vmem [shape: f32[32,1], index: 2, kind: input, shape index: {}]   ;;  %s1508_s3 = inlined_call_operand.vmem [shape: bf16[32,256], index: 3, kind: input, shape index: {}]   ;;  %s1509_s4 = inlined_call_operand.vmem [shape: f32[1,256], index: 4, kind: input, shape index: {}]   ;;  %s1510_s5 = inlined_call_operand.hbm [shape: f32[2,256,256], index: 5, kind: output, shape index: {}]  }
   0x1   :  { %12 = vsyncpa [#allocation3 + $0x1], 0 }
   0x2   :  { %13 = vsyncpa [#allocation4], 0 }
   0x3   :  { %15 = vsyncpa [#allocation4 + $0x1], 0  ;;  %s1119_s18 = smov 0   ;;  %s1121_s19 = smov 0  }
   0x4   :  { %s1123_s20 = smov 0   ;;  %s1125_s21 = smov 0  }
   0x5 LB: > { %s1140_s22 = sadd.s32 4294967295, %s1082_s21   ;;  %s852_s23 = sadd.s32 4294967294, %s1082_s21   ;;  %s1082_s21 = sphi %s1125_s21, %s1520_s21   ;;  %s1078_s20 = sphi %s1123_s20, %s1519_s20   ;;  %s1074_s19 = sphi %s1121_s19, %s1518_s19   ;;  %s1070_s18 = sphi %s1119_s18, %s1517_s18  }
   0x6   : > { %s1144_s24 = sadd.s32 1, %s1082_s21   ;;  %s28_s25 = sadd.s32 1, %s1078_s20 }
   0x7   : > { %s25_s26 = ssub.s32 %s1082_s21, %s1144_s24  ;;  %p35_p0 = scmp.ne.s32.totalorder %s1078_s20, %s1074_s19 }
   0x8   : > { %p26_p1 = scmp.eq.s32.totalorder %s25_s26, 0  ;;  %p36_p2 = scmp.eq.s32.totalorder %s1082_s21, 0 }
   0x9   : > { %p41_p3 = scmp.ne.s32.totalorder %s1074_s19, %s1070_s18  ;;  %p42_p4 = scmp.eq.s32.totalorder %s1140_s22, 0 }
   0xa   : > { %s1156_s27 = scalar_select %p26_p1, %s1078_s20, %s28_s25  }
   0xb   : > { %p1158_p5 = por %p36_p2, %p35_p0  ;;  %p1162_p6 = por %p42_p4, %p41_p3 }
   0xc   : > { %p149_p7 = scmp.eq.s32.totalorder %s1140_s22, 1  ;;  %p155_p8 = scmp.eq.s32.totalorder %s852_s23, 1 }
   0xd   : > { %p936_p10 = scmp.lt.s32.totalorder %s1082_s21, 2  ;;  %s187_s7 = sand.u32 1, %s1078_s20  }
   0xe   : > { %p1169_p11 = por %p149_p7, %p35_p0  ;;  %p1173_p12 = por %p155_p8, %p41_p3 }
   0xf   : > { %s914_s8 = sshll.u32 %s1082_s21, 6  ;;  %s855_s9 = sshll.u32 %s187_s7, 6 }
  0x10   : > { %s196_s12 = scalar_lea.hbm %s1505_s0, %s914_s8  ;;  %s191_s14 = scalar_lea.vmem [#allocation2], %s855_s9 }
  0x11   : > { %s197_s13 = sshll.u32 %s196_s12, 4  ;;  %s199_s15 = sshll.u32 %s191_s14, 4  ;;  %s198_s13 = int_to_ptr.hbm [resolvable:$true] %s197_s13  ;;  %s200_s15 = int_to_ptr.vmem [resolvable:$true] %s199_s15 }
  0x12   : > { %p1184_p13 = pnand %p936_p10, %p1158_p5  ;;  %p858_p0 = scmp.ge.s32.totalorder %s1082_s21, 1 }
  0x13   : > { %p207_p1 = scmp.lt.s32.totalorder %s1082_s21, 3  ;;  %s188_s17 = scalar_lea.sflag [#allocation3], %s187_s7 }
  0x14   : > { %s986_s23 = sshra.s32 %s198_s13, 4  ;;  %p990_p3 = pneg %p1184_p13  ;;  %s987_s23 = int_to_ptr.hbm [resolvable:$true] %s986_s23 }
  0x15   : > { %s988_s25 = scalar_lea.hbm %s987_s23, 64  ;;  %s993_s28 = scalar_lea.hbm %s1505_s0, 128 }
  0x16   : > { %p989_p2 = scmp.ne.s32.totalorder %s987_s23, %s988_s25  ;;  %p994_p5 = scmp.lt.s32.totalorder %s987_s23, %s1505_s0 }
  0x17   : > { %p995_p8 = scmp.lt.s32.totalorder %s993_s28, %s988_s25 }
  0x18   : > { %p991_p4 = pnand %p990_p3, %p989_p2 }
  0x19   : > { %p996_p10 = por %p995_p8, %p994_p5 }
  0x1a   : > { %p992_p7 = pneg %p991_p4 }
  0x1c   : > { %p997_p9 = pnand %p996_p10, %p992_p7 }
  0x1e   : > { %1000 = shalt.err (!%p997_p9)
}
  0x1f   : > { %s1084_s7 = smov 256   ;;  %s1085_s11 = smov 16  }
  0x20   : > { %931 = dma.hbm_to_vmem [thread:$0]  (!%p1184_p13), %s198_s13, 1024, %s200_s15, %s188_s17, %s1084_s7, %s1084_s7, %s1085_s11  }
  0x21   : > { %p208_p2 = pnand %p858_p0, %p207_p1 }
  0x22   : > { %s1205_s12 = sand.u32 (!%p208_p2), 1, %s1074_s19  }
  0x23   : > { %211 = sbr.rel (%p208_p2) target bundleno = 878 (0x36e), region = 40  ;;  %s859_s14 = sshll.u32 (!%p208_p2), %s1205_s12, 6 }
  0x24   : > { %s214_s23 = scalar_lea.sflag (!%p208_p2), [#allocation3], %s1205_s12  ;;  %s217_s25 = scalar_lea.vmem (!%p208_p2), [#allocation2], %s859_s14 }
  0x28   : > { %1061 = dma.done.wait (%p1162_p6), %s214_s23, 1024  }
  0x29   : > { %1063 = vsyncadd (%p1162_p6), %s214_s23, 4294966272  ;;  %v250_v0 = vld [vmem:[%s217_s25 + $0x20] sm:$0xff]  ;;  %v251_v1 = vld [vmem:[%s217_s25 + $0x28] sm:$0xff]  ;;  %v1086_v40 = vmov 0   ;;  %vm472_vm12 = vcmask 261120   ;;  %s860_s17 = sshll.u32 %s1205_s12, 9 }
  0x2a   : > { %v246_v2 = vld [vmem:[%s217_s25] sm:$0xff]  ;;  %v260_v3 = vadd.f32 %v251_v1, %v250_v0  ;;  %v247_v4 = vld [vmem:[%s217_s25 + $0x8] sm:$0xff]  ;;  %v252_v6 = vld [vmem:[%s217_s25 + $0x30] sm:$0xff]  ;;  %977 = vset.pattern.permute.xlu1 %v1086_v40  ;;  %975 = vset.pattern.permute.xlu2 %v1086_v40  ;;  %s1343_s26 = scalar_lea.vmem [#allocation5], %s860_s17  ;;  %s919_s8 = sshll.u32 %s1140_s22, 9 }
  0x2b   : > { %v254_v5 = vadd.f32 %v247_v4, %v246_v2  ;;  %v253_v7 = vld [vmem:[%s217_s25 + $0x38] sm:$0xff]  ;;  %v248_v8 = vld [vmem:[%s217_s25 + $0x10] sm:$0xff]  ;;  %v382_v41 = vld [vmem:[%s1507_s2] sm:$0xff]  ;;  %976 = vset.pattern.permute.xlu0 %v1086_v40  ;;  %s775_s10 = scalar_lea.hbm %s1510_s5, %s919_s8  ;;  %s776_s7 = sshll.u32 %s1343_s26, 4  ;;  %s777_s7 = int_to_ptr.vmem [resolvable:$true] %s776_s7 }
  0x2c   : > { %261 = vadd.xlane.f32.xlu1 %v260_v3  ;;  %v249_v9 = vld [vmem:[%s217_s25 + $0x18] sm:$0xff]  ;;  %v263_v10 = vadd.f32 %v253_v7, %v252_v6  ;;  %v917_v40 = vld [vmem:[%s1508_s3 + $0x14] sm:$0xf]  ;;  %s778_s11 = sshll.u32 %s775_s10, 4  ;;  %s764_s22 = scalar_lea.sflag [#allocation4], %s1205_s12  ;;  %s779_s11 = int_to_ptr.hbm [resolvable:$true] %s778_s11 }
  0x2d   : > { %255 = vadd.xlane.f32.xlu0 %v254_v5  ;;  %v257_v11 = vadd.f32 %v249_v9, %v248_v8  ;;  %s1030_s14 = sshra.s32 %s779_s11, 4  ;;  %s1036_s13 = scalar_lea.hbm %s1510_s5, 1024  ;;  %s1031_s14 = int_to_ptr.hbm [resolvable:$true] %s1030_s14 }
  0x2e   : > { %s1032_s23 = scalar_lea.hbm %s1031_s14, 512  ;;  %p1037_p0 = scmp.lt.s32.totalorder %s1031_s14, %s1510_s5 }
  0x2f   : > { %p1033_p6 = scmp.ne.s32.totalorder %s1031_s14, %s1032_s23  ;;  %p1038_p1 = scmp.lt.s32.totalorder %s1036_s13, %s1032_s23 }
  0x31   : > { %p1034_p9 = pnand %p1033_p6, %p1169_p11  ;;  %p1039_p3 = por %p1038_p1, %p1037_p0 }
  0x33   : > { %p1035_p13 = pneg %p1034_p9 }
  0x34   : > { %264 = vadd.xlane.f32.xlu1 %v263_v10 }
  0x35   : > { %258 = vadd.xlane.f32.xlu0 %v257_v11  ;;  %p1040_p4 = pnand %p1039_p3, %p1035_p13 }
  0x9f   : > { %v262_v12 = vpop.xlane.xlu1 %261 }
  0xa0   : > { %v268_v13 = vmul.f32 0.00390625, %v262_v12  ;;  %v256_v14 = vpop.xlane.xlu0 %255 }
  0xa1   : > { %v266_v15 = vmul.f32 0.00390625, %v256_v14 }
  0xa2   : > { %v1213_v16 = vsub.f32 %v250_v0, %v268_v13  ;;  %v1215_v17 = vsub.f32 %v251_v1, %v268_v13  ;;  %v305_v13 = vld [vmem:[%s1506_s1 + $0x18] sm:$0xff] }
  0xa3   : > { %v1217_v18 = vsub.f32 %v246_v2, %v266_v15  ;;  %v1219_v19 = vsub.f32 %v247_v4, %v266_v15  ;;  %v302_v2 = vld [vmem:[%s1506_s1] sm:$0xff] }
  0xa4   : > { %v282_v20 = vmul.f32 %v1213_v16, %v1213_v16  ;;  %v283_v21 = vmul.f32 %v1215_v17, %v1215_v17 }
  0xa5   : > { %v278_v22 = vmul.f32 %v1217_v18, %v1217_v18  ;;  %v279_v23 = vmul.f32 %v1219_v19, %v1219_v19 }
  0xa6   : > { %v292_v24 = vadd.f32 %v283_v21, %v282_v20  ;;  %v303_v20 = vld [vmem:[%s1506_s1 + $0x8] sm:$0xff] }
  0xa7   : > { %v265_v25 = vpop.xlane.xlu1 %264  ;;  %v286_v26 = vadd.f32 %v279_v23, %v278_v22 }
  0xa8   : > { %v269_v27 = vmul.f32 0.00390625, %v265_v25  ;;  %v259_v28 = vpop.xlane.xlu0 %258  ;;  %293 = vadd.xlane.f32.xlu0 %v292_v24  ;;  %v383_v24 = vld [vmem:[%s1507_s2 + $0x8] sm:$0xff] }
  0xa9   : > { %v267_v29 = vmul.f32 0.00390625, %v259_v28  ;;  %287 = vadd.xlane.f32.xlu2 %v286_v26  ;;  %v304_v28 = vld [vmem:[%s1506_s1 + $0x10] sm:$0xff] }
  0xaa   : > { %v1229_v30 = vsub.f32 %v252_v6, %v269_v27  ;;  %v1231_v31 = vsub.f32 %v253_v7, %v269_v27 }
  0xab   : > { %v1233_v32 = vsub.f32 %v248_v8, %v267_v29  ;;  %v1235_v33 = vsub.f32 %v249_v9, %v267_v29 }
  0xac   : > { %v284_v34 = vmul.f32 %v1229_v30, %v1229_v30  ;;  %v285_v35 = vmul.f32 %v1231_v31, %v1231_v31 }
  0xad   : > { %v280_v36 = vmul.f32 %v1233_v32, %v1233_v32  ;;  %v281_v37 = vmul.f32 %v1235_v33, %v1235_v33 }
  0xae   : > { %v295_v38 = vadd.f32 %v285_v35, %v284_v34  ;;  %v385_v34 = vld [vmem:[%s1507_s2 + $0x18] sm:$0xff] }
  0xaf   : > { %v289_v39 = vadd.f32 %v281_v37, %v280_v36  ;;  %v384_v36 = vld [vmem:[%s1507_s2 + $0x10] sm:$0xff] }
  0xb0   : > { %296 = vadd.xlane.f32.xlu1 %v295_v38  ;;  %v871_v38 = vld [vmem:[%s1508_s3 + $0x10] sm:$0xf] }
  0xb1   : > { %290 = vadd.xlane.f32.xlu2 %v289_v39  ;;  %v918_v39 = vld [vmem:[%s1508_s3 + $0x14] sm:$0xf0] }
  0xc9   : > { %388 = vperm.xlu1 %977, %v382_v41   ;;  %v872_v41 = vor.u32 %v918_v39, %v871_v38 }
  0xcb   : > { %527 = vmatpush.bf16.msra.mxu0 %v872_v41  ;;  %920 = vmatpush.bf16.msra.mxu2 %v872_v41 }
 0x11b   : > { %v294_v42 = vpop.xlane.xlu0 %293 }
 0x11c   : > { %v288_v43 = vpop.xlane.xlu2 %287  ;;  %v300_v44 = vmul.f32 0.00390625, %v294_v42  ;;  %v873_v42 = vld [vmem:[%s1508_s3 + $0x18] sm:$0xf0] }
 0x11d   : > { %v298_v45 = vmul.f32 0.00390625, %v288_v43  ;;  %v863_v43 = vld [vmem:[%s1508_s3] sm:$0xf] }
 0x11e   : > { %v308_v47 = vadd.f32 1e-06, %v300_v44  ;;  %v916_v44 = vld [vmem:[%s1508_s3 + $0x4] sm:$0xf0] }
 0x11f   : > { %v306_v46 = vadd.f32 1e-06, %v298_v45  ;;  %v876_v45 = vor.u32 %v917_v40, %v873_v42 }
 0x120   : > { %vm336_vm9 = vweird.f32 %v308_v47 }
 0x121   : > { %978 = vrsqrt.f32 %v306_v46  ;;  %vm316_vm1 = vweird.f32 %v306_v46  ;;  %616 = vmatpush.bf16.msra.mxu1 %v876_v45  ;;  %922 = vmatpush.bf16.msra.mxu3 %v876_v45 }
 0x122   : > { %980 = vrsqrt.f32 %v308_v47 }
 0x123   : > { %v297_v48 = vpop.xlane.xlu1 %296 }
 0x124   : > { %v301_v49 = vmul.f32 0.00390625, %v297_v48  ;;  %v291_v50 = vpop.xlane.xlu2 %290  ;;  %v864_v48 = vor.u32 %v916_v44, %v863_v43 }
 0x125   : > { %v299_v51 = vmul.f32 0.00390625, %v291_v50 }
 0x126   : > { %v309_v52 = vadd.f32 1e-06, %v301_v49  ;;  %528 = vmatpush.bf16.msra.mxu0 %v864_v48  ;;  %921 = vmatpush.bf16.msra.mxu2 %v864_v48 }
 0x127   : > { %v979_v53 = vpop.eup %978  ;;  %v307_v54 = vadd.f32 1e-06, %v299_v51 }
 0x128   : > { %v311_v55 = vmul.f32 %v979_v53, %v306_v46  ;;  %982 = vrsqrt.f32 %v309_v52  ;;  %v981_v56 = vpop.eup %980  ;;  %vm317_vm0 = vweird.f32 %v979_v53  ;;  %vm346_vm3 = vweird.f32 %v309_v52  ;;  %v915_v46 = vld [vmem:[%s1508_s3 + $0x4] sm:$0xf] }
 0x129   : > { %984 = vrsqrt.f32 %v307_v54  ;;  %v331_v59 = vmul.f32 %v981_v56, %v308_v47  ;;  %vm318_vm2 = vmor %vm316_vm1, %vm317_vm0  ;;  %vm326_vm7 = vweird.f32 %v307_v54  ;;  %vm337_vm10 = vweird.f32 %v981_v56  ;;  %v865_v47 = vld [vmem:[%s1508_s3 + $0x8] sm:$0xf0] }
 0x12a   : > { %v312_v57 = vmul.f32 %v979_v53, %v311_v55  ;;  %vm338_vm11 = vmor %vm336_vm9, %vm337_vm10  ;;  %v868_v49 = vor.u32 %v915_v46, %v865_v47 }
 0x12b   : > { %v332_v0 = vmul.f32 %v981_v56, %v331_v59 }
 0x12c   : > { %v313_v58 = vmul.f32 0.5, %v312_v57  ;;  %617 = vmatpush.bf16.msra.mxu1 %v868_v49  ;;  %923 = vmatpush.bf16.msra.mxu3 %v868_v49 }
 0x12d   : > { %v333_v9 = vmul.f32 0.5, %v332_v0 }
 0x12e   : > { %v983_v60 = vpop.eup %982  ;;  %v314_v61 = vsub.f32 1.5, %v313_v58 }
 0x12f   : > { %v985_v62 = vpop.eup %984  ;;  %v341_v63 = vmul.f32 %v983_v60, %v309_v52  ;;  %vm347_vm4 = vweird.f32 %v983_v60  ;;  %v334_v15 = vsub.f32 1.5, %v333_v9 }
 0x130   : > { %v321_v1 = vmul.f32 %v985_v62, %v307_v54  ;;  %v315_v3 = vmul.f32 %v979_v53, %v314_v61  ;;  %vm327_vm5 = vweird.f32 %v985_v62  ;;  %vm348_vm6 = vmor %vm346_vm3, %vm347_vm4 }
 0x131   : > { %v342_v4 = vmul.f32 %v983_v60, %v341_v63  ;;  %vm328_vm8 = vmor %vm326_vm7, %vm327_vm5  ;;  %v335_v27 = vmul.f32 %v981_v56, %v334_v15 }
 0x132   : > { %v322_v5 = vmul.f32 %v985_v62, %v321_v1  ;;  %v319_v6 = vsel %vm318_vm2, %v979_v53, %v315_v3 }
 0x133   : > { %v343_v7 = vmul.f32 0.5, %v342_v4  ;;  %v350_v8 = vmul.f32 %v319_v6, %v302_v2  ;;  %v339_v29 = vsel %vm338_vm11, %v981_v56, %v335_v27 }
 0x134   : > { %v323_v10 = vmul.f32 0.5, %v322_v5  ;;  %v352_v35 = vmul.f32 %v339_v29, %v304_v28 }
 0x135   : > { %v344_v11 = vsub.f32 1.5, %v343_v7  ;;  %356 = vperm.xlu2 %975, %v350_v8  }
 0x136   : > { %v324_v12 = vsub.f32 1.5, %v323_v10 }
 0x137   : > { %v345_v14 = vmul.f32 %v983_v60, %v344_v11 }
 0x138   : > { %v325_v21 = vmul.f32 %v985_v62, %v324_v12 }
 0x139   : > { %v349_v22 = vsel %vm348_vm6, %v983_v60, %v345_v14 }
 0x13a   : > { %v353_v23 = vmul.f32 %v349_v22, %v305_v13  ;;  %v329_v25 = vsel %vm328_vm8, %v985_v62, %v325_v21 }
 0x13b   : > { %v351_v26 = vmul.f32 %v329_v25, %v303_v20  ;;  %v389_v50 = vpop.permute.xlu1 %388  ;;  %v422_v25 = vld [vmem:[%s1509_s4] sm:$0x3] }
 0x13c   : > { %371 = vperm.xlu1 %977, %v353_v23   ;;  %v1339_v27 = vperm.slane %v422_v25, 1 }
 0x13d   : > { %393 = vperm.xlu2 %975, %v383_v24   ;;  %361 = vperm.xlu0 %976, %v351_v26   ;;  %v1337_v26 = vperm.slane %v422_v25, 0 }
 0x144   : > { %403 = vperm.xlu1 %977, %v385_v34  }
 0x145   : > { %366 = vperm.xlu2 %975, %v352_v35  }
 0x14d   : > { %398 = vperm.xlu2 %975, %v384_v36  }
 0x18f   : > { %v357_v37 = vpop.permute.xlu2 %356 }
 0x190   : > { %v374_v52 = vmul.f32 %v357_v37, %v1217_v18  ;;  %v375_v53 = vmul.f32 %v357_v37, %v1219_v19 }
 0x192   : > { %v406_v57 = vadd.f32 %v389_v50, %v374_v52  ;;  %v407_v58 = vadd.f32 %v389_v50, %v375_v53 }
 0x197   : > { %v394_v51 = vpop.permute.xlu2 %393 }
 0x19f   : > { %v367_v0 = vpop.permute.xlu2 %366 }
 0x1a0   : > { %v378_v3 = vmul.f32 %v367_v0, %v1213_v16 }
 0x1a7   : > { %v399_v2 = vpop.permute.xlu2 %398 }
 0x1a8   : > { %v410_v5 = vadd.f32 %v399_v2, %v378_v3 }
 0x1ae   : > { %v372_v61 = vpop.permute.xlu1 %371 }
 0x1af   : > { %v362_v54 = vpop.permute.xlu0 %361  ;;  %v380_v18 = vmul.f32 %v372_v61, %v1229_v30  ;;  %v381_v19 = vmul.f32 %v372_v61, %v1231_v31 }
 0x1b0   : > { %v376_v55 = vmul.f32 %v362_v54, %v1233_v32  ;;  %v377_v56 = vmul.f32 %v362_v54, %v1235_v33  ;;  %v379_v32 = vmul.f32 %v367_v0, %v1215_v17 }
 0x1b2   : > { %v408_v59 = vadd.f32 %v394_v51, %v376_v55  ;;  %v409_v60 = vadd.f32 %v394_v51, %v377_v56  ;;  %v411_v6 = vadd.f32 %v399_v2, %v379_v32 }
 0x1b4   : > { %v414_v62 = vpack.c.bf16 %v408_v59, %v406_v57  ;;  %v415_v63 = vpack.c.bf16 %v409_v60, %v407_v58 }
 0x1b6   : > { %428 = vxpose.binary.xlu0.c.b16.start [1/4] (short) %v415_v63, %v414_v62, 128  ;;  %v404_v1 = vpop.permute.xlu1 %403 }
 0x1b7   : > { %v412_v33 = vadd.f32 %v404_v1, %v380_v18  ;;  %v413_v4 = vadd.f32 %v404_v1, %v381_v19 }
 0x1b9   : > { %v416_v7 = vpack.c.bf16 %v412_v33, %v410_v5  ;;  %v417_v8 = vpack.c.bf16 %v413_v4, %v411_v6 }
 0x1c6   : > { %429 = vxpose.binary.xlu0.c.b16.end [2/4] (short) %v417_v8, %v416_v7, 128 }
 0x262   : > { %v436_v9 = vpop.trf.xlu0 }
 0x263   : > { %877 = vmatmul.msk.bf16.vlgmr.msra.gmra.mxu0 %vm472_vm12, %v436_v9  ;;  %893 = vmatmul.msk.bf16.vlgmr.msra.gmra.mxu1 %vm472_vm12, %v436_v9 }
 0x26a   : > { %v437_v30 = vpop.trf.xlu0 }
 0x26b   : > { %885 = vmatmul.msk.bf16.vlgmr.msra.gmra.mxu2 %vm472_vm12, %v437_v30  ;;  %901 = vmatmul.msk.bf16.vlgmr.msra.gmra.mxu3 %vm472_vm12, %v437_v30 }
 0x272   : > { %v438_v16 = vpop.trf.xlu0 }
 0x273   : > { %878 = vmatmul.msk.bf16.gmra.mxu0 %vm472_vm12, %v438_v16  ;;  %894 = vmatmul.msk.bf16.gmra.mxu1 %vm472_vm12, %v438_v16 }
 0x27a   : > { %v439_v17 = vpop.trf.xlu0 }
 0x27b   : > { %886 = vmatmul.msk.bf16.gmra.mxu2 %vm472_vm12, %v439_v17  ;;  %902 = vmatmul.msk.bf16.gmra.mxu3 %vm472_vm12, %v439_v17 }
 0x282   : > { %v440_v31 = vpop.trf.xlu0 }
 0x283   : > { %879 = vmatmul.msk.bf16.gmra.mxu0 %vm472_vm12, %v440_v31  ;;  %895 = vmatmul.msk.bf16.gmra.mxu1 %vm472_vm12, %v440_v31 }
 0x28a   : > { %v441_v10 = vpop.trf.xlu0 }
 0x28b   : > { %887 = vmatmul.msk.bf16.gmra.mxu2 %vm472_vm12, %v441_v10  ;;  %903 = vmatmul.msk.bf16.gmra.mxu3 %vm472_vm12, %v441_v10 }
 0x292   : > { %v442_v11 = vpop.trf.xlu0 }
 0x293   : > { %880 = vmatmul.msk.bf16.gmra.mxu0 %vm472_vm12, %v442_v11  ;;  %896 = vmatmul.msk.bf16.gmra.mxu1 %vm472_vm12, %v442_v11 }
 0x29a   : > { %v443_v12 = vpop.trf.xlu0 }
 0x29b   : > { %888 = vmatmul.msk.bf16.gmra.mxu2 %vm472_vm12, %v443_v12  ;;  %904 = vmatmul.msk.bf16.gmra.mxu3 %vm472_vm12, %v443_v12 }
 0x2a2   : > { %v444_v13 = vpop.trf.xlu0 }
 0x2a3   : > { %881 = vmatmul.msk.bf16.gmra.mxu0 %vm472_vm12, %v444_v13  ;;  %897 = vmatmul.msk.bf16.gmra.mxu1 %vm472_vm12, %v444_v13 }
 0x2aa   : > { %v445_v14 = vpop.trf.xlu0 }
 0x2ab   : > { %889 = vmatmul.msk.bf16.gmra.mxu2 %vm472_vm12, %v445_v14  ;;  %905 = vmatmul.msk.bf16.gmra.mxu3 %vm472_vm12, %v445_v14 }
 0x2b2   : > { %v446_v15 = vpop.trf.xlu0 }
 0x2b3   : > { %882 = vmatmul.msk.bf16.gmra.mxu0 %vm472_vm12, %v446_v15  ;;  %898 = vmatmul.msk.bf16.gmra.mxu1 %vm472_vm12, %v446_v15 }
 0x2ba   : > { %v447_v20 = vpop.trf.xlu0 }
 0x2bb   : > { %890 = vmatmul.msk.bf16.gmra.mxu2 %vm472_vm12, %v447_v20  ;;  %906 = vmatmul.msk.bf16.gmra.mxu3 %vm472_vm12, %v447_v20 }
 0x2c2   : > { %v448_v21 = vpop.trf.xlu0 }
 0x2c3   : > { %883 = vmatmul.msk.bf16.gmra.mxu0 %vm472_vm12, %v448_v21  ;;  %899 = vmatmul.msk.bf16.gmra.mxu1 %vm472_vm12, %v448_v21 }
 0x2ca   : > { %v449_v22 = vpop.trf.xlu0 }
 0x2cb   : > { %891 = vmatmul.msk.bf16.gmra.mxu2 %vm472_vm12, %v449_v22  ;;  %907 = vmatmul.msk.bf16.gmra.mxu3 %vm472_vm12, %v449_v22 }
 0x2d2   : > { %v450_v23 = vpop.trf.xlu0 }
 0x2d3   : > { %884 = vmatmul.msk.bf16.gmra.mxu0 %vm472_vm12, %v450_v23  ;;  %900 = vmatmul.msk.bf16.gmra.mxu1 %vm472_vm12, %v450_v23 }
 0x2da   : > { %v451_v24 = vpop.trf.xlu0 }
 0x2db   : > { %892 = vmatmul.msk.bf16.gmra.mxu2 %vm472_vm12, %v451_v24  ;;  %908 = vmatmul.msk.bf16.gmra.mxu3 %vm472_vm12, %v451_v24 }
 0x2e0   : > { %v530_v28 = vpop.f32.mrf.mxu0  ;;  %v619_v29 = vpop.f32.mrf.mxu1 }
 0x2e1   : > { %v531_v34 = vadd.f32 %v530_v28, %v1337_v26  ;;  %v620_v35 = vadd.f32 %v619_v29, %v1339_v27 }
 0x2e3   : > { %699 = vst [vmem:[%s1343_s26] sm:$0xff] %v531_v34 }
 0x2e4   : > { %700 = vst [vmem:[%s1343_s26 + $0x8] sm:$0xff] %v620_v35 }
 0x2e8   : > { %v532_v36 = vpop.f32.mrf.mxu0  ;;  %v621_v37 = vpop.f32.mrf.mxu1 }
 0x2e9   : > { %v533_v38 = vadd.f32 %v532_v36, %v1337_v26  ;;  %v622_v39 = vadd.f32 %v621_v37, %v1339_v27 }
 0x2eb   : > { %701 = vst [vmem:[%s1343_s26 + $0x10] sm:$0xff] %v533_v38 }
 0x2ec   : > { %702 = vst [vmem:[%s1343_s26 + $0x18] sm:$0xff] %v622_v39 }
 0x2ee   : > { %v570_v40 = vpop.f32.mrf.mxu2  ;;  %v659_v41 = vpop.f32.mrf.mxu3 }
 0x2ef   : > { %v571_v42 = vadd.f32 %v570_v40, %v1337_v26  ;;  %v660_v43 = vadd.f32 %v659_v41, %v1339_v27 }
 0x2f0   : > { %v535_v44 = vpop.f32.mrf.mxu0  ;;  %v624_v45 = vpop.f32.mrf.mxu1 }
 0x2f1   : > { %731 = vst [vmem:[%s1343_s26 + $0x100] sm:$0xff] %v571_v42  ;;  %v536_v46 = vadd.f32 %v535_v44, %v1337_v26  ;;  %v625_v47 = vadd.f32 %v624_v45, %v1339_v27 }
 0x2f2   : > { %732 = vst [vmem:[%s1343_s26 + $0x108] sm:$0xff] %v660_v43 }
 0x2f3   : > { %703 = vst [vmem:[%s1343_s26 + $0x20] sm:$0xff] %v536_v46 }
 0x2f4   : > { %704 = vst [vmem:[%s1343_s26 + $0x28] sm:$0xff] %v625_v47 }
 0x2f6   : > { %v572_v48 = vpop.f32.mrf.mxu2  ;;  %v661_v49 = vpop.f32.mrf.mxu3 }
 0x2f7   : > { %v573_v50 = vadd.f32 %v572_v48, %v1337_v26  ;;  %v662_v51 = vadd.f32 %v661_v49, %v1339_v27 }
 0x2f8   : > { %v537_v52 = vpop.f32.mrf.mxu0  ;;  %v626_v53 = vpop.f32.mrf.mxu1 }
 0x2f9   : > { %733 = vst [vmem:[%s1343_s26 + $0x110] sm:$0xff] %v573_v50  ;;  %v538_v54 = vadd.f32 %v537_v52, %v1337_v26  ;;  %v627_v55 = vadd.f32 %v626_v53, %v1339_v27 }
 0x2fa   : > { %734 = vst [vmem:[%s1343_s26 + $0x118] sm:$0xff] %v662_v51 }
 0x2fb   : > { %705 = vst [vmem:[%s1343_s26 + $0x30] sm:$0xff] %v538_v54 }
 0x2fc   : > { %706 = vst [vmem:[%s1343_s26 + $0x38] sm:$0xff] %v627_v55 }
 0x2fe   : > { %v575_v56 = vpop.f32.mrf.mxu2  ;;  %v664_v57 = vpop.f32.mrf.mxu3 }
 0x2ff   : > { %v576_v58 = vadd.f32 %v575_v56, %v1337_v26  ;;  %v665_v59 = vadd.f32 %v664_v57, %v1339_v27 }
 0x300   : > { %v540_v60 = vpop.f32.mrf.mxu0  ;;  %v629_v61 = vpop.f32.mrf.mxu1 }
 0x301   : > { %735 = vst [vmem:[%s1343_s26 + $0x120] sm:$0xff] %v576_v58  ;;  %v541_v62 = vadd.f32 %v540_v60, %v1337_v26  ;;  %v630_v63 = vadd.f32 %v629_v61, %v1339_v27 }
 0x302   : > { %736 = vst [vmem:[%s1343_s26 + $0x128] sm:$0xff] %v665_v59 }
 0x303   : > { %707 = vst [vmem:[%s1343_s26 + $0x40] sm:$0xff] %v541_v62 }
 0x304   : > { %708 = vst [vmem:[%s1343_s26 + $0x48] sm:$0xff] %v630_v63 }
 0x306   : > { %v577_v0 = vpop.f32.mrf.mxu2  ;;  %v666_v1 = vpop.f32.mrf.mxu3 }
 0x307   : > { %v578_v18 = vadd.f32 %v577_v0, %v1337_v26  ;;  %v667_v19 = vadd.f32 %v666_v1, %v1339_v27 }
 0x308   : > { %v542_v2 = vpop.f32.mrf.mxu0  ;;  %v631_v3 = vpop.f32.mrf.mxu1 }
 0x309   : > { %737 = vst [vmem:[%s1343_s26 + $0x130] sm:$0xff] %v578_v18  ;;  %v543_v32 = vadd.f32 %v542_v2, %v1337_v26  ;;  %v632_v33 = vadd.f32 %v631_v3, %v1339_v27 }
 0x30a   : > { %738 = vst [vmem:[%s1343_s26 + $0x138] sm:$0xff] %v667_v19 }
 0x30b   : > { %709 = vst [vmem:[%s1343_s26 + $0x50] sm:$0xff] %v543_v32 }
 0x30c   : > { %710 = vst [vmem:[%s1343_s26 + $0x58] sm:$0xff] %v632_v33 }
 0x30e   : > { %v580_v4 = vpop.f32.mrf.mxu2  ;;  %v669_v5 = vpop.f32.mrf.mxu3 }
 0x30f   : > { %v581_v6 = vadd.f32 %v580_v4, %v1337_v26  ;;  %v670_v7 = vadd.f32 %v669_v5, %v1339_v27 }
 0x310   : > { %v545_v8 = vpop.f32.mrf.mxu0  ;;  %v634_v9 = vpop.f32.mrf.mxu1 }
 0x311   : > { %739 = vst [vmem:[%s1343_s26 + $0x140] sm:$0xff] %v581_v6  ;;  %v546_v30 = vadd.f32 %v545_v8, %v1337_v26  ;;  %v635_v16 = vadd.f32 %v634_v9, %v1339_v27 }
 0x312   : > { %740 = vst [vmem:[%s1343_s26 + $0x148] sm:$0xff] %v670_v7 }
 0x313   : > { %711 = vst [vmem:[%s1343_s26 + $0x60] sm:$0xff] %v546_v30 }
 0x314   : > { %712 = vst [vmem:[%s1343_s26 + $0x68] sm:$0xff] %v635_v16 }
 0x316   : > { %v582_v17 = vpop.f32.mrf.mxu2  ;;  %v671_v31 = vpop.f32.mrf.mxu3 }
 0x317   : > { %v583_v10 = vadd.f32 %v582_v17, %v1337_v26  ;;  %v672_v11 = vadd.f32 %v671_v31, %v1339_v27 }
 0x318   : > { %v547_v12 = vpop.f32.mrf.mxu0  ;;  %v636_v13 = vpop.f32.mrf.mxu1 }
 0x319   : > { %741 = vst [vmem:[%s1343_s26 + $0x150] sm:$0xff] %v583_v10  ;;  %v548_v14 = vadd.f32 %v547_v12, %v1337_v26  ;;  %v637_v15 = vadd.f32 %v636_v13, %v1339_v27 }
 0x31a   : > { %742 = vst [vmem:[%s1343_s26 + $0x158] sm:$0xff] %v672_v11 }
 0x31b   : > { %713 = vst [vmem:[%s1343_s26 + $0x70] sm:$0xff] %v548_v14 }
 0x31c   : > { %714 = vst [vmem:[%s1343_s26 + $0x78] sm:$0xff] %v637_v15 }
 0x31e   : > { %v585_v20 = vpop.f32.mrf.mxu2  ;;  %v674_v21 = vpop.f32.mrf.mxu3 }
 0x31f   : > { %v586_v22 = vadd.f32 %v585_v20, %v1337_v26  ;;  %v675_v23 = vadd.f32 %v674_v21, %v1339_v27 }
 0x320   : > { %v550_v24 = vpop.f32.mrf.mxu0  ;;  %v639_v25 = vpop.f32.mrf.mxu1 }
 0x321   : > { %743 = vst [vmem:[%s1343_s26 + $0x160] sm:$0xff] %v586_v22  ;;  %v551_v28 = vadd.f32 %v550_v24, %v1337_v26  ;;  %v640_v29 = vadd.f32 %v639_v25, %v1339_v27 }
 0x322   : > { %744 = vst [vmem:[%s1343_s26 + $0x168] sm:$0xff] %v675_v23 }
 0x323   : > { %715 = vst [vmem:[%s1343_s26 + $0x80] sm:$0xff] %v551_v28 }
 0x324   : > { %716 = vst [vmem:[%s1343_s26 + $0x88] sm:$0xff] %v640_v29 }
 0x326   : > { %v587_v34 = vpop.f32.mrf.mxu2  ;;  %v676_v35 = vpop.f32.mrf.mxu3 }
 0x327   : > { %v588_v36 = vadd.f32 %v587_v34, %v1337_v26  ;;  %v677_v37 = vadd.f32 %v676_v35, %v1339_v27 }
 0x328   : > { %v552_v38 = vpop.f32.mrf.mxu0  ;;  %v641_v39 = vpop.f32.mrf.mxu1 }
 0x329   : > { %745 = vst [vmem:[%s1343_s26 + $0x170] sm:$0xff] %v588_v36  ;;  %v553_v40 = vadd.f32 %v552_v38, %v1337_v26  ;;  %v642_v41 = vadd.f32 %v641_v39, %v1339_v27 }
 0x32a   : > { %746 = vst [vmem:[%s1343_s26 + $0x178] sm:$0xff] %v677_v37 }
 0x32b   : > { %717 = vst [vmem:[%s1343_s26 + $0x90] sm:$0xff] %v553_v40 }
 0x32c   : > { %718 = vst [vmem:[%s1343_s26 + $0x98] sm:$0xff] %v642_v41 }
 0x32e   : > { %v590_v42 = vpop.f32.mrf.mxu2  ;;  %v679_v43 = vpop.f32.mrf.mxu3 }
 0x32f   : > { %v591_v44 = vadd.f32 %v590_v42, %v1337_v26  ;;  %v680_v45 = vadd.f32 %v679_v43, %v1339_v27 }
 0x330   : > { %v555_v46 = vpop.f32.mrf.mxu0  ;;  %v644_v47 = vpop.f32.mrf.mxu1 }
 0x331   : > { %747 = vst [vmem:[%s1343_s26 + $0x180] sm:$0xff] %v591_v44  ;;  %v556_v48 = vadd.f32 %v555_v46, %v1337_v26  ;;  %v645_v49 = vadd.f32 %v644_v47, %v1339_v27 }
 0x332   : > { %748 = vst [vmem:[%s1343_s26 + $0x188] sm:$0xff] %v680_v45 }
 0x333   : > { %719 = vst [vmem:[%s1343_s26 + $0xa0] sm:$0xff] %v556_v48 }
 0x334   : > { %720 = vst [vmem:[%s1343_s26 + $0xa8] sm:$0xff] %v645_v49 }
 0x336   : > { %v592_v50 = vpop.f32.mrf.mxu2  ;;  %v681_v51 = vpop.f32.mrf.mxu3 }
 0x337   : > { %v593_v52 = vadd.f32 %v592_v50, %v1337_v26  ;;  %v682_v53 = vadd.f32 %v681_v51, %v1339_v27 }
 0x338   : > { %v557_v54 = vpop.f32.mrf.mxu0  ;;  %v646_v55 = vpop.f32.mrf.mxu1 }
 0x339   : > { %749 = vst [vmem:[%s1343_s26 + $0x190] sm:$0xff] %v593_v52  ;;  %v558_v56 = vadd.f32 %v557_v54, %v1337_v26  ;;  %v647_v57 = vadd.f32 %v646_v55, %v1339_v27 }
 0x33a   : > { %750 = vst [vmem:[%s1343_s26 + $0x198] sm:$0xff] %v682_v53 }
 0x33b   : > { %721 = vst [vmem:[%s1343_s26 + $0xb0] sm:$0xff] %v558_v56 }
 0x33c   : > { %722 = vst [vmem:[%s1343_s26 + $0xb8] sm:$0xff] %v647_v57 }
 0x33e   : > { %v595_v58 = vpop.f32.mrf.mxu2  ;;  %v684_v59 = vpop.f32.mrf.mxu3 }
 0x33f   : > { %v596_v60 = vadd.f32 %v595_v58, %v1337_v26  ;;  %v685_v61 = vadd.f32 %v684_v59, %v1339_v27 }
 0x340   : > { %v560_v62 = vpop.f32.mrf.mxu0  ;;  %v649_v63 = vpop.f32.mrf.mxu1 }
 0x341   : > { %751 = vst [vmem:[%s1343_s26 + $0x1a0] sm:$0xff] %v596_v60  ;;  %v561_v0 = vadd.f32 %v560_v62, %v1337_v26  ;;  %v650_v1 = vadd.f32 %v649_v63, %v1339_v27 }
 0x342   : > { %752 = vst [vmem:[%s1343_s26 + $0x1a8] sm:$0xff] %v685_v61 }
 0x343   : > { %723 = vst [vmem:[%s1343_s26 + $0xc0] sm:$0xff] %v561_v0 }
 0x344   : > { %724 = vst [vmem:[%s1343_s26 + $0xc8] sm:$0xff] %v650_v1 }
 0x346   : > { %v597_v18 = vpop.f32.mrf.mxu2  ;;  %v686_v19 = vpop.f32.mrf.mxu3 }
 0x347   : > { %v598_v2 = vadd.f32 %v597_v18, %v1337_v26  ;;  %v687_v3 = vadd.f32 %v686_v19, %v1339_v27 }
 0x348   : > { %v562_v32 = vpop.f32.mrf.mxu0  ;;  %v651_v33 = vpop.f32.mrf.mxu1 }
 0x349   : > { %753 = vst [vmem:[%s1343_s26 + $0x1b0] sm:$0xff] %v598_v2  ;;  %v563_v4 = vadd.f32 %v562_v32, %v1337_v26  ;;  %v652_v5 = vadd.f32 %v651_v33, %v1339_v27 }
 0x34a   : > { %754 = vst [vmem:[%s1343_s26 + $0x1b8] sm:$0xff] %v687_v3 }
 0x34b   : > { %725 = vst [vmem:[%s1343_s26 + $0xd0] sm:$0xff] %v563_v4 }
 0x34c   : > { %726 = vst [vmem:[%s1343_s26 + $0xd8] sm:$0xff] %v652_v5 }
 0x34e   : > { %v600_v6 = vpop.f32.mrf.mxu2  ;;  %v689_v7 = vpop.f32.mrf.mxu3 }
 0x34f   : > { %v601_v8 = vadd.f32 %v600_v6, %v1337_v26  ;;  %v690_v9 = vadd.f32 %v689_v7, %v1339_v27 }
 0x350   : > { %v565_v30 = vpop.f32.mrf.mxu0  ;;  %v654_v16 = vpop.f32.mrf.mxu1 }
 0x351   : > { %755 = vst [vmem:[%s1343_s26 + $0x1c0] sm:$0xff] %v601_v8  ;;  %v566_v17 = vadd.f32 %v565_v30, %v1337_v26  ;;  %v655_v31 = vadd.f32 %v654_v16, %v1339_v27 }
 0x352   : > { %756 = vst [vmem:[%s1343_s26 + $0x1c8] sm:$0xff] %v690_v9 }
 0x353   : > { %727 = vst [vmem:[%s1343_s26 + $0xe0] sm:$0xff] %v566_v17 }
 0x354   : > { %728 = vst [vmem:[%s1343_s26 + $0xe8] sm:$0xff] %v655_v31 }
 0x356   : > { %v602_v10 = vpop.f32.mrf.mxu2  ;;  %v691_v11 = vpop.f32.mrf.mxu3 }
 0x357   : > { %v603_v12 = vadd.f32 %v602_v10, %v1337_v26  ;;  %v692_v13 = vadd.f32 %v691_v11, %v1339_v27 }
 0x358   : > { %v567_v14 = vpop.f32.mrf.mxu0  ;;  %v656_v15 = vpop.f32.mrf.mxu1 }
 0x359   : > { %757 = vst [vmem:[%s1343_s26 + $0x1d0] sm:$0xff] %v603_v12  ;;  %v568_v20 = vadd.f32 %v567_v14, %v1337_v26  ;;  %v657_v21 = vadd.f32 %v656_v15, %v1339_v27 }
 0x35a   : > { %758 = vst [vmem:[%s1343_s26 + $0x1d8] sm:$0xff] %v692_v13 }
 0x35b   : > { %729 = vst [vmem:[%s1343_s26 + $0xf0] sm:$0xff] %v568_v20 }
 0x35c   : > { %730 = vst [vmem:[%s1343_s26 + $0xf8] sm:$0xff] %v657_v21 }
 0x35e   : > { %v605_v22 = vpop.f32.mrf.mxu2  ;;  %v694_v23 = vpop.f32.mrf.mxu3 }
 0x35f   : > { %v606_v24 = vadd.f32 %v605_v22, %v1337_v26  ;;  %v695_v25 = vadd.f32 %v694_v23, %v1339_v27 }
 0x361   : > { %759 = vst [vmem:[%s1343_s26 + $0x1e0] sm:$0xff] %v606_v24 }
 0x362   : > { %760 = vst [vmem:[%s1343_s26 + $0x1e8] sm:$0xff] %v695_v25 }
 0x366   : > { %v607_v28 = vpop.f32.mrf.mxu2  ;;  %v696_v29 = vpop.f32.mrf.mxu3 }
 0x367   : > { %v608_v34 = vadd.f32 %v607_v28, %v1337_v26  ;;  %v697_v35 = vadd.f32 %v696_v29, %v1339_v27 }
 0x369   : > { %761 = vst [vmem:[%s1343_s26 + $0x1f0] sm:$0xff] %v608_v34 }
 0x36a   : > { %762 = vst [vmem:[%s1343_s26 + $0x1f8] sm:$0xff] %v697_v35 }
 0x36b   : > { %1043 = shalt.err (!%p1040_p4)
}
 0x36c   : > { %s1087_s12 = smov 256   ;;  %s1088_s17 = smov 16  }
 0x36d   : > { %926 = dma.vmem_to_hbm [thread:$0]  (%p1169_p11), %s777_s7, 8192, %s779_s11, %s764_s22, %s1087_s12, %s1087_s12, %s1088_s17  }
 0x36e PF: > { %s793_s26 = sand.u32 1, %s1070_s18   ;;  %p1516_p7 = scmp.ge.s32.totalorder %s1082_s21, 2 }
 0x36f   : > { %s794_s8 = scalar_lea.sflag [#allocation4], %s793_s26 }
 0x370   : > { %p933_p5 = pnand %p1516_p7, %p1173_p12 }
 0x372   : > { %p934_p8 = pneg %p933_p5 }
 0x374   : > { %1065 = dma.done.wait (%p934_p8), %s794_s8, 8192  }
 0x375   : > { %1067 = vsyncadd (%p934_p8), %s794_s8, 4294959104  ;;  %p18_p10 = scmp.ge.s32.totalorder %s1144_s24, 4   ;;  %s1517_s18 = smov %s1074_s19 }
 0x376   : > { %s1518_s19 = smov %s1078_s20  ;;  %s1519_s20 = smov %s1156_s27 }
 0x377   : > { %s1520_s21 = smov %s1144_s24  ;;  %20 = sbr.rel (!%p18_p10) target bundleno = 5 (0x5), region = 85 }
 0x37c   :  { %800 = vsyncpa [#allocation3], 1 }
 0x37d   :  { %802 = vsyncpa [#allocation3 + $0x1], 1 }
 0x37e   :  { %803 = vsyncpa [#allocation4], 1 }
 0x37f   :  { %805 = vsyncpa [#allocation4 + $0x1], 1 }

</bundles_post_ra>
